<compile_context>
chip_gen: v7x
topology: tpu7x:2x2x1
jax: 0.10.0
libtpu: 0.0.40
codegen_flags: <defaults>
</compile_context>

<pallas_src>
import functools

import jax
import jax.numpy as jnp
from jax.experimental import pallas as pl
from jax.experimental.pallas import tpu as pltpu


def _mse_partial_kernel(x_ref, y_ref, o_ref):
    """Accumulate per-(sublane, lane) partial sums of (x - y)^2 over the k axis.

    The output block index is constant along k, so o_ref stays VMEM-resident for the
    whole reduction — no scratch accumulator and no final copy are needed.
    """
    k = pl.program_id(1)

    @pl.when(k == 0)
    def _():
        o_ref[...] = jnp.zeros_like(o_ref)

    d = x_ref[...].astype(jnp.float32) - y_ref[...].astype(jnp.float32)
    sq = d * d
    tile_rows, lanes = sq.shape  # static
    # Fold along 8-row (f32 sublane) groups: pure VPU adds, no per-step XLU
    # cross-lane reduction, and a short loop-carried dependency.
    o_ref[0] += jnp.sum(sq.reshape(tile_rows // 8, 8, lanes), axis=0)


def _device_kind():
    try:
        return jax.devices()[0].device_kind.lower()
    except Exception:
        return ""


def _num_tensorcores(kind):
    # v7x exposes 2 TensorCores per device; v5e / v6e have 1.
    return 2 if "v7" in kind else 1


def _physical_vmem_bytes(kind):
    try:
        return int(pltpu.get_tpu_info().vmem_capacity_bytes)
    except Exception:
        # Conservative fallbacks: v7x has 64 MiB per TC, older chips 128 MiB.
        return (64 << 20) if "v7" in kind else (128 << 20)


def _default_block_bytes(kind):
    # v5e HBM (~0.8 TB/s) makes a 2 MiB step already ~5 us of DMA, so the ~0.35 us
    # per-grid-step overhead is <8%; v6e/v7x benefit from 4 MiB blocks.
    if ("v5e" in kind) or ("v5 lite" in kind) or ("v5lite" in kind):
        return 2 << 20
    return 4 << 20


def _pick_tiling(total, itemsize, target_block_bytes):
    """Choose (lanes, tile_rows, rows) for a flat array, or None if no clean tiling.

    Only exact tilings are returned (no padding => no extra HBM copies in the wrapper).
    tile_rows is kept a multiple of the packed-sublane granularity of the input dtype
    (8 for 4-byte, 16 for 2-byte, 32 for 1-byte dtypes) so packed loads stay unmasked.
    """
    target_elems = max(8 * 128, target_block_bytes // itemsize)
    grain0 = max(8, 32 // itemsize)
    grains = (grain0, 8) if grain0 != 8 else (8,)

    for grain in grains:
        for lanes in (1024, 512, 256, 128):
            if total % lanes:
                continue
            rows = total // lanes
            if rows % grain:
                continue
            t = (min(target_elems // lanes, rows) // grain) * grain
            t = max(t, grain)
            while rows % t:
                t -= grain
            # Quality gate: avoid a huge grid of tiny blocks (per-step overhead tax).
            if t * lanes * itemsize >= (256 << 10) or rows // t <= 16:
                return lanes, t, rows
    return None


def hint_learning_loss(logits, targets, *, target_block_bytes=None, num_splits=None):
    """MSE(logits, targets) with mean reduction, computed in a Pallas kernel."""
    assert logits.shape == targets.shape, "student/teacher hints must match in shape"
    total = logits.size
    itemsize = jnp.dtype(logits.dtype).itemsize

    kind = _device_kind()
    cores = _num_tensorcores(kind)
    physical_vmem = _physical_vmem_bytes(kind)

    if target_block_bytes is None:
        target_block_bytes = _default_block_bytes(kind)
    # Clamp block size so 2 operands x 2 buffers + ~4 block-sized f32 temporaries
    # (upcasts / diff / square) + headroom fit comfortably in physical VMEM.
    denom = 4.0 + 16.0 / itemsize
    cap = int((0.7 * physical_vmem - (2 << 20)) / denom)
    target_block_bytes = max(min(target_block_bytes, cap), 128 << 10)

    tiling = _pick_tiling(total, itemsize, target_block_bytes)
    if tiling is None:
        # Ragged / tiny shapes: XLA's fused elementwise+reduce reads each operand
        # exactly once (HBM-optimal) — strictly better than padding copies.
        d = logits.astype(jnp.float32) - targets.astype(jnp.float32)
        return jnp.mean(d * d)

    lanes, tile_rows, rows = tiling
    x2 = logits.reshape(rows, lanes)  # contiguous reshape: free, no HBM copy
    y2 = targets.reshape(rows, lanes)

    num_blocks = rows // tile_rows
    if num_splits is None:
        num_splits = cores  # 2 on v7x, 1 on v5e/v6e
    splits = 1
    if num_splits > 1 and num_blocks >= num_splits and num_blocks % num_splits == 0:
        splits = num_splits
    steps = num_blocks // splits

    # Only a *real* 2-TC chip gets CORE_PARALLEL (plain "parallel" does not shard
    # across v7x TensorCores); on 1-TC chips both axes are plain sequential.
    if splits > 1 and cores > 1:
        dim_sem = (pltpu.CORE_PARALLEL, pltpu.ARBITRARY)
    else:
        dim_sem = ("arbitrary", "arbitrary")

    block_elems = tile_rows * lanes
    block_bytes = block_elems * itemsize
    out_bytes = splits * 8 * lanes * 4
    # Explicit VMEM budget: double-buffered inputs + f32 elementwise temps + output.
    budget = 4 * block_bytes + 4 * block_elems * 4 + out_bytes + (2 << 20)
    vmem_limit = int(min(0.9 * physical_vmem, max(2 * budget, 48 << 20)))

    in_spec = pl.BlockSpec((tile_rows, lanes), lambda i, k: (i * steps + k, 0))
    out_spec = pl.BlockSpec((1, 8, lanes), lambda i, k: (i, 0, 0))

    partial_sums = pl.pallas_call(
        _mse_partial_kernel,
        out_shape=jax.ShapeDtypeStruct((splits, 8, lanes), jnp.float32),
        grid_spec=pltpu.PrefetchScalarGridSpec(
            num_scalar_prefetch=0,
            grid=(splits, steps),
            in_specs=[in_spec, in_spec],
            out_specs=out_spec,
        ),
        compiler_params=pltpu.CompilerParams(
            dimension_semantics=dim_sem,
            vmem_limit_bytes=vmem_limit,
        ),
        cost_estimate=pl.CostEstimate(
            flops=3 * total,
            transcendentals=0,
            bytes_accessed=2 * total * itemsize + out_bytes,
        ),
    )(x2, y2)

    # Single tiny cross-lane reduction + mean, done once outside the hot loop.
    return jnp.sum(partial_sums) / total


if __name__ == "__main__":
    # HintLearningLoss has no learnable parameters (plain MSE between hint features).
    key = jax.random.PRNGKey(0)
    k1, k2, k3, k4 = jax.random.split(key, 4)

    # Student / teacher intermediate feature maps, NCHW: [B=2, C=4, H=16, W=16].
    logits = jax.random.normal(k1, (2, 4, 16, 16), dtype=jnp.float32)
    targets = jax.random.normal(k2, (2, 4, 16, 16), dtype=jnp.float32)

    loss = jax.block_until_ready(jax.jit(hint_learning_loss)(logits, targets))
    ref = jnp.mean((logits - targets) ** 2)
    assert jnp.allclose(loss, ref, rtol=1e-5, atol=1e-6), (loss, ref)

    # Exercise the multi-step reduction and the 2-split partial-sum path
    # (CORE_PARALLEL only engages on real 2-TC chips; elsewhere it stays sequential).
    a = jax.random.normal(k3, (8, 16, 32, 32), dtype=jnp.float32)
    b = jax.random.normal(k4, (8, 16, 32, 32), dtype=jnp.float32)
    loss2 = jax.block_until_ready(
        jax.jit(functools.partial(hint_learning_loss,
                                  target_block_bytes=64 * 1024,
                                  num_splits=2))(a, b))
    ref2 = jnp.mean((a - b) ** 2)
    assert jnp.allclose(loss2, ref2, rtol=1e-5, atol=1e-6), (loss2, ref2)

    # Exercise the bf16 path (packed-sublane granularity 16, in-kernel f32 upcast).
    ab = jax.random.normal(k3, (4, 16, 32, 32), dtype=jnp.bfloat16)
    bb = jax.random.normal(k4, (4, 16, 32, 32), dtype=jnp.bfloat16)
    loss3 = jax.block_until_ready(jax.jit(hint_learning_loss)(ab, bb))
    ref3 = jnp.mean((ab.astype(jnp.float32) - bb.astype(jnp.float32)) ** 2)
    assert jnp.allclose(loss3, ref3, rtol=1e-4, atol=1e-6), (loss3, ref3)

    # Ragged shape: handled by the fused XLA fallback (no padding copies).
    c = jax.random.normal(k1, (2, 3, 5, 7), dtype=jnp.float32)
    d = jax.random.normal(k2, (2, 3, 5, 7), dtype=jnp.float32)
    loss4 = jax.block_until_ready(jax.jit(hint_learning_loss)(c, d))
    ref4 = jnp.mean((c - d) ** 2)
    assert jnp.allclose(loss4, ref4, rtol=1e-5, atol=1e-6), (loss4, ref4)

    print("KERNEL_OK")
</pallas_src>

<mosaic_0001>
module attributes {stable_mosaic.version = 11 : i64} {
  func.func @_mse_partial_kernel(%arg0: i32, %arg1: i32, %arg2: memref<8x256xf32, #tpu.memory_space<vmem>>, %arg3: memref<8x256xf32, #tpu.memory_space<vmem>>, %arg4: memref<1x8x256xf32, #tpu.memory_space<vmem>>) attributes {dimension_semantics = [#tpu.dimension_semantics<arbitrary>, #tpu.dimension_semantics<arbitrary>], iteration_bounds = array<i64: 1, 1>, scalar_prefetch = 0 : i64, scratch_operands = 0 : i64, tpu.core_type = #tpu.core_type<tc>, window_params = [{transform_indices = @transform_0, window_bounds = array<i64: 8, 256>}, {transform_indices = @transform_1, window_bounds = array<i64: 8, 256>}, {transform_indices = @transform_2, window_bounds = array<i64: 1, 8, 256>}]} {
    %c0_i32 = arith.constant 0 : i32
    %0 = arith.cmpi eq, %arg1, %c0_i32 : i32
    %1 = arith.extui %0 : i1 to i32
    %c0_i32_0 = arith.constant 0 : i32
    %2 = arith.cmpi ne, %1, %c0_i32_0 : i32
    scf.if %2 {
      %cst_10 = arith.constant 0.000000e+00 : f32
      %15 = vector.broadcast %cst_10 : f32 to vector<1x8x256xf32>
      %c0_11 = arith.constant 0 : index
      %c0_12 = arith.constant 0 : index
      %c0_13 = arith.constant 0 : index
      %16 = vector.load %arg4[%c0_11, %c0_12, %c0_13] : memref<1x8x256xf32, #tpu.memory_space<vmem>>, vector<1x8x256xf32>
      tpu.vector_store %arg4[%c0_11, %c0_12, %c0_13], %15 {strides = array<i32>} : memref<1x8x256xf32, #tpu.memory_space<vmem>>, vector<1x8x256xf32>,
    } else {
    }
    %c0 = arith.constant 0 : index
    %c0_1 = arith.constant 0 : index
    %3 = vector.load %arg2[%c0, %c0_1] : memref<8x256xf32, #tpu.memory_space<vmem>>, vector<8x256xf32>
    %c0_2 = arith.constant 0 : index
    %c0_3 = arith.constant 0 : index
    %4 = vector.load %arg3[%c0_2, %c0_3] : memref<8x256xf32, #tpu.memory_space<vmem>>, vector<8x256xf32>
    %5 = arith.subf %3, %4 : vector<8x256xf32>
    %6 = arith.mulf %5, %5 : vector<8x256xf32>
    %c0_4 = arith.constant 0 : index
    %c0_5 = arith.constant 0 : index
    %c0_6 = arith.constant 0 : index
    %7 = vector.load %arg4[%c0_4, %c0_5, %c0_6] : memref<1x8x256xf32, #tpu.memory_space<vmem>>, vector<1x8x256xf32>
    %8 = vector.shape_cast %7 : vector<1x8x256xf32> to vector<8x256xf32>
    %9 = vector.shape_cast %6 : vector<8x256xf32> to vector<1x8x256xf32>
    %cst = arith.constant dense<0.000000e+00> : vector<8x256xf32>
    %10 = vector.multi_reduction <add>, %9, %cst [0] : vector<1x8x256xf32> to vector<8x256xf32>
    %11 = arith.addf %8, %10 : vector<8x256xf32>
    %c0_7 = arith.constant 0 : index
    %c0_8 = arith.constant 0 : index
    %c0_9 = arith.constant 0 : index
    %12 = vector.load %arg4[%c0_7, %c0_8, %c0_9] : memref<1x8x256xf32, #tpu.memory_space<vmem>>, vector<1x8x256xf32>
    %13 = vector.shape_cast %12 : vector<1x8x256xf32> to vector<8x256xf32>
    %14 = vector.shape_cast %11 : vector<8x256xf32> to vector<1x8x256xf32>
    tpu.vector_store %arg4[%c0_7, %c0_8, %c0_9], %14 {strides = array<i32>} : memref<1x8x256xf32, #tpu.memory_space<vmem>>, vector<1x8x256xf32>,
    return
  }
  func.func @transform_0(%arg0: i32, %arg1: i32) -> (i32, i32) {
    %c1_i32 = arith.constant 1 : i32
    %0 = arith.muli %arg0, %c1_i32 : i32
    %1 = arith.addi %0, %arg1 : i32
    %c0_i32 = arith.constant 0 : i32
    %c0_i32_0 = arith.constant 0 : i32
    return %1, %c0_i32 : i32, i32
  }
  func.func @transform_1(%arg0: i32, %arg1: i32) -> (i32, i32) {
    %c1_i32 = arith.constant 1 : i32
    %0 = arith.muli %arg0, %c1_i32 : i32
    %1 = arith.addi %0, %arg1 : i32
    %c0_i32 = arith.constant 0 : i32
    %c0_i32_0 = arith.constant 0 : i32
    return %1, %c0_i32 : i32, i32
  }
  func.func @transform_2(%arg0: i32, %arg1: i32) -> (i32, i32, i32) {
    %c0_i32 = arith.constant 0 : i32
    %c0_i32_0 = arith.constant 0 : i32
    %c0_i32_1 = arith.constant 0 : i32
    return %arg0, %c0_i32, %c0_i32_0 : i32, i32, i32
  }
}

</mosaic_0001>

<bundles_post_ra>
// kernel: hint_learning_loss.1
= control target key start
LH: loop header
LB: loop body
LE: loop exit
PB: predicated region body
PF: predicated region fallthrough
CT: control target
= control target key end

     0   :  { %s123_s0 = inlined_call_operand.vmem [shape: f32[8,256], index: 0, kind: input, shape index: {}]   ;;  %s124_s1 = inlined_call_operand.vmem [shape: f32[8,256], index: 1, kind: input, shape index: {}]   ;;  %s125_s2 = inlined_call_operand.vmem [shape: f32[1,8,256], index: 2, kind: output, shape index: {}]  }
   0x1   :  { %v57_v0 = vld [vmem:[%s123_s0] sm:$0xff]  ;;  %v58_v2 = vld [vmem:[%s123_s0 + $0x8] sm:$0xff] }
   0x2   :  { %v59_v1 = vld [vmem:[%s124_s1] sm:$0xff]  ;;  %v60_v4 = vld [vmem:[%s124_s1 + $0x8] sm:$0xff] }
   0x3   :  { %v61_v3 = vsub.f32 %v57_v0, %v59_v1  ;;  %v62_v5 = vsub.f32 %v58_v2, %v60_v4 }
   0x5   :  { %v63_v6 = vmul.f32 %v61_v3, %v61_v3  ;;  %v64_v7 = vmul.f32 %v62_v5, %v62_v5 }
   0x7   :  { %71 = vst [vmem:[%s125_s2] sm:$0xff] %v63_v6  ;;  %72 = vst [vmem:[%s125_s2 + $0x8] sm:$0xff] %v64_v7 }

</bundles_post_ra>
